<compile_context>
chip_gen: v5e
topology: v5e:2x2
jax: 0.10.0
libtpu: 0.0.40
codegen_flags: <defaults>
</compile_context>

<pallas_src>
import functools
import math

import jax
import jax.numpy as jnp
from jax.experimental import pallas as pl
from jax.experimental.pallas import tpu as pltpu


_VMEM_BUDGET = 44 * 1024 * 1024  # conservative: fits v7x 64 MiB with headroom


def _round_up(x: int, m: int) -> int:
    return ((x + m - 1) // m) * m


def _linear_kernel(x_ref, w_ref, b_ref, o_ref, *, compute_dtype):
    # x_ref: (tm, K)  w_ref: (K, tn)  b_ref: (1, tn)  o_ref: (tm, tn)
    x = x_ref[...]
    w = w_ref[...]
    if compute_dtype is not None:
        # In-kernel cast: no extra HBM pass, ~3x fewer MXU passes than f32.
        x = x.astype(compute_dtype)
        w = w.astype(compute_dtype)
    acc = jnp.dot(x, w, preferred_element_type=jnp.float32)
    o_ref[...] = (acc + b_ref[...].astype(jnp.float32)).astype(o_ref.dtype)


def prepare_classification_head_params(weight, bias, *, weight_dtype=None):
    """One-time weight/bias prep (hoist out of the per-call hot path).

    weight: (nb_classes, embed_dim) PyTorch layout
    bias:   (nb_classes,)
    Returns (w_padded (K, Np), b_padded (1, Np)) with Np a multiple of 256.
    """
    nb_classes, _ = weight.shape
    n_pad = _round_up(nb_classes, 256)
    w2 = jnp.pad(weight.T, ((0, 0), (0, n_pad - nb_classes)))   # (K, Np)
    b2 = jnp.pad(bias, (0, n_pad - nb_classes)).reshape(1, n_pad)
    if weight_dtype is not None:
        w2 = w2.astype(weight_dtype)
    return w2, b2


def _pick_tn(n_pad, K, w_bytes, tn_max=2048):
    """Largest class-tile (multiple of 256, divides Np) fitting the budget."""
    tn = max(256, min(n_pad, tn_max) - (min(n_pad, tn_max) % 256))
    while tn > 256 and (n_pad % tn != 0
                        or 2 * K * tn * w_bytes > _VMEM_BUDGET // 2):
        tn -= 256
    return tn


def _pick_tm(M, K, tn, x_bytes, out_bytes, w_vmem_bytes, tm_max=512):
    """Largest row tile (multiple of 16) fitting the VMEM budget."""
    tm = max(16, min(_round_up(tm_max, 16), _round_up(M, 16)))
    while tm > 16:
        need = w_vmem_bytes + 2 * tm * K * x_bytes + 2 * tm * tn * out_bytes
        if need <= _VMEM_BUDGET:
            break
        tm = max(16, _round_up(tm // 2, 16))
    return tm


def classification_head_forward(src, w_padded, b_padded, nb_classes, *,
                                compute_dtype=None, tm_max=512):
    """y = src @ weight.T + bias using pre-prepared (padded) weight/bias.

    src:      (..., embed_dim)
    w_padded: (embed_dim, Np)  from prepare_classification_head_params
    b_padded: (1, Np)
    """
    out_dtype = src.dtype
    *lead, K = src.shape
    k_w, n_pad = w_padded.shape
    assert K == k_w, "embed_dim mismatch between src and weight"
    assert n_pad % 256 == 0 and n_pad >= nb_classes

    M = 1
    for d in lead:
        M *= d
    if M == 0:
        return jnp.zeros((*lead, nb_classes), out_dtype)

    x_bytes = jnp.dtype(src.dtype).itemsize
    w_bytes = jnp.dtype(w_padded.dtype).itemsize
    out_bytes = jnp.dtype(out_dtype).itemsize

    # --- tile selection against the VMEM budget ---
    tn = _pick_tn(n_pad, K, w_bytes)
    grid_n = n_pad // tn
    buf_w = 1 if grid_n == 1 else 2            # single-buffer resident weight
    w_vmem = buf_w * (K * tn * w_bytes + tn * 4)

    tm = _pick_tm(M, K, tn, x_bytes, out_bytes, w_vmem, tm_max=tm_max)
    # v7x has 2 TensorCores: prefer >=2 grid steps along a parallel axis.
    if pl.cdiv(M, tm) * grid_n < 2 and M >= 32:
        tm = max(16, _round_up(pl.cdiv(M, 2), 16))
    m_pad = _round_up(M, tm)
    grid_m = m_pad // tm

    # --- activations: flatten leading dims; pad rows only if needed (K stays
    #     unpadded: block dim == full array dim is allowed) ---
    x2 = src.reshape(M, K)
    if m_pad > M:
        x2 = jnp.pad(x2, ((0, m_pad - M), (0, 0)))

    kernel = functools.partial(_linear_kernel, compute_dtype=compute_dtype)

    if grid_n == 1:
        # Constant block index across the whole grid -> stage once, no
        # double-buffering (halves resident weight VMEM).
        w_spec = pl.BlockSpec((K, tn), lambda i, j: (0, j),
                              pipeline_mode=pl.Buffered(1))
        b_spec = pl.BlockSpec((1, tn), lambda i, j: (0, j),
                              pipeline_mode=pl.Buffered(1))
    else:
        w_spec = pl.BlockSpec((K, tn), lambda i, j: (0, j))
        b_spec = pl.BlockSpec((1, tn), lambda i, j: (0, j))

    vmem_need = w_vmem + 2 * tm * K * x_bytes + 2 * tm * tn * out_bytes
    vmem_limit = min(max(vmem_need + (8 << 20), 32 << 20), 56 << 20)

    cost = pl.CostEstimate(
        flops=2 * M * K * nb_classes,
        transcendentals=0,
        bytes_accessed=(M * K * x_bytes + K * nb_classes * w_bytes
                        + nb_classes * 4 + M * nb_classes * out_bytes))

    out = pl.pallas_call(
        kernel,
        out_shape=jax.ShapeDtypeStruct((m_pad, n_pad), out_dtype),
        grid_spec=pltpu.PrefetchScalarGridSpec(
            num_scalar_prefetch=0,
            grid=(grid_m, grid_n),
            in_specs=[
                pl.BlockSpec((tm, K), lambda i, j: (i, 0)),  # activations
                w_spec,                                       # weight tile
                b_spec,                                       # bias tile
            ],
            out_specs=pl.BlockSpec((tm, tn), lambda i, j: (i, j)),
        ),
        compiler_params=pltpu.CompilerParams(
            dimension_semantics=("parallel", "parallel"),
            vmem_limit_bytes=vmem_limit),
        cost_estimate=cost,
    )(x2, w_padded, b_padded)

    out = out[:M, :nb_classes]
    return out.reshape(*lead, nb_classes)


def classification_head(src, weight, bias, *, compute_dtype=None, tm_max=512):
    """Convenience wrapper matching nn.Linear(embed_dim, nb_classes)(src)."""
    nb_classes = weight.shape[0]
    w2, b2 = prepare_classification_head_params(weight, bias,
                                                weight_dtype=compute_dtype)
    return classification_head_forward(src, w2, b2, nb_classes,
                                       compute_dtype=compute_dtype,
                                       tm_max=tm_max)


def reference_forward(src, weight, bias):
    return src @ weight.T + bias


if __name__ == "__main__":
    # Small shapes consistent with the module: (B, N, embed_dim) embeddings
    # through a linear classification head.
    B, N, embed_dim, nb_classes = 2, 8, 32, 10

    key = jax.random.PRNGKey(0)
    kw, kb, kx = jax.random.split(key, 3)

    bound = 1.0 / math.sqrt(embed_dim)
    weight = jax.random.uniform(kw, (nb_classes, embed_dim), jnp.float32,
                                -bound, bound)
    bias = jax.random.uniform(kb, (nb_classes,), jnp.float32, -bound, bound)
    src = jax.random.normal(kx, (B, N, embed_dim), jnp.float32)

    ref = reference_forward(src, weight, bias)

    # f32 path (matches PyTorch numerics); weight prepared once (hoisted).
    w_pad, b_pad = prepare_classification_head_params(weight, bias)
    out = classification_head_forward(src, w_pad, b_pad, nb_classes)
    out = jax.block_until_ready(out)
    assert out.shape == ref.shape, f"shape mismatch {out.shape} vs {ref.shape}"
    assert jnp.allclose(out, ref, atol=1e-4, rtol=1e-4), \
        "f32 mismatch vs reference"

    # bf16-operand / f32-accumulate path (in-kernel cast), looser tolerance.
    out_bf16 = classification_head(src, weight, bias,
                                   compute_dtype=jnp.bfloat16)
    out_bf16 = jax.block_until_ready(out_bf16)
    assert jnp.allclose(out_bf16, ref, atol=5e-2, rtol=5e-2), \
        "bf16 mismatch vs reference"

    print("KERNEL_OK")
</pallas_src>

<mosaic_0001>
module attributes {stable_mosaic.version = 11 : i64} {
  func.func @_linear_kernel(%arg0: i32, %arg1: i32, %arg2: memref<16x32xf32, #tpu.memory_space<vmem>>, %arg3: memref<32x256xf32, #tpu.memory_space<vmem>>, %arg4: memref<1x256xf32, #tpu.memory_space<vmem>>, %arg5: memref<16x256xf32, #tpu.memory_space<vmem>>) attributes {dimension_semantics = [#tpu.dimension_semantics<parallel>, #tpu.dimension_semantics<parallel>], iteration_bounds = array<i64: 1, 1>, scalar_prefetch = 0 : i64, scratch_operands = 0 : i64, tpu.core_type = #tpu.core_type<tc>, window_params = [{transform_indices = @transform_0, window_bounds = array<i64: 16, 32>}, {pipeline_mode = #tpu.pipeline_mode<synchronous>, transform_indices = @transform_1, window_bounds = array<i64: 32, 256>}, {pipeline_mode = #tpu.pipeline_mode<synchronous>, transform_indices = @transform_2, window_bounds = array<i64: 1, 256>}, {transform_indices = @transform_3, window_bounds = array<i64: 16, 256>}]} {
    %c0 = arith.constant 0 : index
    %c0_0 = arith.constant 0 : index
    %0 = vector.load %arg2[%c0, %c0_0] : memref<16x32xf32, #tpu.memory_space<vmem>>, vector<16x32xf32>
    %c0_1 = arith.constant 0 : index
    %c0_2 = arith.constant 0 : index
    %1 = vector.load %arg3[%c0_1, %c0_2] : memref<32x256xf32, #tpu.memory_space<vmem>>, vector<32x256xf32>
    %cst = arith.constant dense<0.000000e+00> : vector<16x256xf32>
    %2 = tpu.matmul %0, %1, %cst {dimension_numbers = #tpu.dot_dimension_numbers<[1], [0], [0], [1], [0, 0, 1, 1], [], []>} : vector<16x32xf32>, vector<32x256xf32>, vector<16x256xf32> -> vector<16x256xf32>
    %c0_3 = arith.constant 0 : index
    %c0_4 = arith.constant 0 : index
    %3 = vector.load %arg4[%c0_3, %c0_4] : memref<1x256xf32, #tpu.memory_space<vmem>>, vector<1x256xf32>
    %4 = vector.broadcast %3 : vector<1x256xf32> to vector<16x256xf32>
    %5 = arith.addf %2, %4 : vector<16x256xf32>
    %c0_5 = arith.constant 0 : index
    %c0_6 = arith.constant 0 : index
    %6 = vector.load %arg5[%c0_5, %c0_6] : memref<16x256xf32, #tpu.memory_space<vmem>>, vector<16x256xf32>
    tpu.vector_store %arg5[%c0_5, %c0_6], %5 {strides = array<i32>} : memref<16x256xf32, #tpu.memory_space<vmem>>, vector<16x256xf32>,
    return
  }
  func.func @transform_0(%arg0: i32, %arg1: i32) -> (i32, i32) {
    %c0_i32 = arith.constant 0 : i32
    %c0_i32_0 = arith.constant 0 : i32
    return %arg0, %c0_i32 : i32, i32
  }
  func.func @transform_1(%arg0: i32, %arg1: i32) -> (i32, i32) {
    %c0_i32 = arith.constant 0 : i32
    %c0_i32_0 = arith.constant 0 : i32
    return %c0_i32, %arg1 : i32, i32
  }
  func.func @transform_2(%arg0: i32, %arg1: i32) -> (i32, i32) {
    %c0_i32 = arith.constant 0 : i32
    %c0_i32_0 = arith.constant 0 : i32
    return %c0_i32, %arg1 : i32, i32
  }
  func.func @transform_3(%arg0: i32, %arg1: i32) -> (i32, i32) {
    %c0_i32 = arith.constant 0 : i32
    return %arg0, %arg1 : i32, i32
  }
}

</mosaic_0001>

<bundles_post_ra>
// kernel: tpu_custom_call.1
= control target key start
LH: loop header
LB: loop body
LE: loop exit
PB: predicated region body
PF: predicated region fallthrough
CT: control target
= control target key end

     0   :  { %8 = vsyncpa [#allocation3], 0  ;;  %s321_s0 = inlined_call_operand.hbm [shape: f32[16,32], index: 0, kind: input, shape index: {}]   ;;  %s322_s1 = inlined_call_operand.hbm [shape: f32[32,256], index: 1, kind: input, shape index: {}]   ;;  %s323_s2 = inlined_call_operand.hbm [shape: f32[1,256], index: 2, kind: input, shape index: {}]   ;;  %s324_s3 = inlined_call_operand.hbm [shape: f32[16,256], index: 3, kind: output, shape index: {}]  }
   0x1   :  { %9 = vsyncpa [#allocation6], 0  ;;  %s28_s14 = sshll.u32 %s322_s1, 4  ;;  %s29_s14 = int_to_ptr.hbm [resolvable:$true] %s28_s14 }
   0x2   :  { %10 = vsyncpa [#allocation4], 0  ;;  %s275_s15 = smov [#allocation5]   ;;  %s15_s19 = sshll.u32 %s321_s0, 4  ;;  %s16_s19 = int_to_ptr.hbm [resolvable:$true] %s15_s19 }
   0x3   :  { %s30_s16 = sshll.u32 %s275_s15, 4  ;;  %s276_s20 = smov 256   ;;  %s31_s16 = int_to_ptr.vmem [resolvable:$true] %s30_s16 }
   0x4   :  { %s277_s21 = smov 16   ;;  %s278_s22 = smov [#allocation2]  }
   0x5   :  { %36 = dma.hbm_to_vmem [thread:$0]  %s29_s14, 1024, %s31_s16, [#allocation6], %s276_s20, %s276_s20, %s277_s21  }
   0x6   :  { %s17_s23 = sshll.u32 %s278_s22, 4  ;;  %s279_s1 = smov 128   ;;  %s18_s23 = int_to_ptr.vmem [resolvable:$true] %s17_s23 }
   0x7   :  { %s280_s24 = smov 8   ;;  %s42_s27 = sshll.u32 %s323_s2, 4  ;;  %s43_s27 = int_to_ptr.hbm [resolvable:$true] %s42_s27 }
   0x8   :  { %23 = dma.hbm_to_vmem [thread:$0]  %s16_s19, 256, %s18_s23, [#allocation3], %s279_s1, %s279_s1, %s280_s24  }
   0x9   :  { %s281_s28 = smov [#allocation7]  }
   0xa   :  { %s44_s0 = sshll.u32 %s281_s28, 4  ;;  %s45_s0 = int_to_ptr.vmem [resolvable:$true] %s44_s0 }
   0xb   :  { %47 = dma.hbm_to_vmem [thread:$0]  %s43_s27, 32, %s45_s0, [#allocation6]  }
   0xc   :  { %269 = dma.done.wait [#allocation3], 256  }
   0xd   :  { %270 = vsyncadd [#allocation3], 4294967040 }
   0xe   :  { %271 = dma.done.wait [#allocation6], 1056  }
   0xf   :  { %272 = vsyncadd [#allocation6], 4294966240  ;;  %v68_v0 = vld [vmem:[#allocation5 + $0x30] sm:$0xff]  ;;  %v69_v1 = vld [vmem:[#allocation5 + $0x38] sm:$0xff]  ;;  %vm76_vm0 = vcmask 261120   ;;  %s282_s2 = smov [#allocation8]  }
  0x10   :  { %v66_v2 = vld [vmem:[#allocation5 + $0x20] sm:$0xff]  ;;  %157 = vmatpush.msra.mxu2 %v68_v0  ;;  %161 = vmatpush.msra.mxu3 %v69_v1  ;;  %v67_v3 = vld [vmem:[#allocation5 + $0x28] sm:$0xff]  ;;  %v64_v4 = vld [vmem:[#allocation5 + $0x10] sm:$0xff]  ;;  %s137_s29 = sshll.u32 %s282_s2, 4  ;;  %s139_s5 = sshll.u32 %s324_s3, 4  ;;  %s138_s29 = int_to_ptr.vmem [resolvable:$true] %s137_s29  ;;  %s140_s5 = int_to_ptr.hbm [resolvable:$true] %s139_s5 }
  0x11   :  { %v65_v5 = vld [vmem:[#allocation5 + $0x18] sm:$0xff]  ;;  %95 = vmatpush.msra.mxu0 %v68_v0  ;;  %118 = vmatpush.msra.mxu1 %v69_v1  ;;  %v62_v6 = vld [vmem:[#allocation5] sm:$0xff]  ;;  %v63_v7 = vld [vmem:[#allocation5 + $0x8] sm:$0xff] }
  0x12   :  { %158 = vmatpush.msra.mxu2 %v66_v2  ;;  %162 = vmatpush.msra.mxu3 %v67_v3  ;;  %v61_v8 = vld [vmem:[#allocation2 + $0x8] sm:$0xff]  ;;  %v60_v9 = vld [vmem:[#allocation2] sm:$0xff]  ;;  %v70_v10 = vld [vmem:[#allocation7] sm:$0x3] }
  0x13   :  { %96 = vmatpush.msra.mxu0 %v66_v2  ;;  %119 = vmatpush.msra.mxu1 %v67_v3  ;;  %v72_v11 = vperm.slane %v70_v10, 0  ;;  %v73_v12 = vperm.slane %v70_v10, 1 }
  0x14   :  { %159 = vmatpush.msra.mxu2 %v64_v4  ;;  %163 = vmatpush.msra.mxu3 %v65_v5 }
  0x15   :  { %97 = vmatpush.msra.mxu0 %v64_v4  ;;  %120 = vmatpush.msra.mxu1 %v65_v5 }
  0x16   :  { %160 = vmatpush.msra.mxu2 %v62_v6  ;;  %164 = vmatpush.msra.mxu3 %v63_v7 }
  0x17   :  { %154 = vmatmul.msk.f32.vlgmr.msra.gmra.mxu2 %vm76_vm0, %v61_v8  ;;  %156 = vmatmul.msk.f32.vlgmr.msra.gmra.mxu3 %vm76_vm0, %v61_v8 }
  0x18   :  { %98 = vmatpush.msra.mxu0 %v62_v6  ;;  %121 = vmatpush.msra.mxu1 %v63_v7 }
  0x19   :  { %153 = vmatmul.msk.f32.vlgmr.msra.gmra.mxu0 %vm76_vm0, %v60_v9  ;;  %155 = vmatmul.msk.f32.vlgmr.msra.gmra.mxu1 %vm76_vm0, %v60_v9 }
  0x96   :  { %v100_v13 = vpop.f32.mrf.mxu0  ;;  %v123_v14 = vpop.f32.mrf.mxu1 }
  0x97   :  { %v101_v15 = vadd.f32 %v100_v13, %v72_v11  ;;  %v124_v16 = vadd.f32 %v123_v14, %v73_v12 }
  0x99   :  { %129 = vst [vmem:[#allocation8] sm:$0xff] %v101_v15 }
  0x9a   :  { %v103_v17 = vpop.f32.mrf.mxu2  ;;  %130 = vst [vmem:[#allocation8 + $0x8] sm:$0xff] %v124_v16  ;;  %v126_v18 = vpop.f32.mrf.mxu3 }
  0x9b   :  { %v104_v19 = vadd.f32 %v103_v17, %v72_v11  ;;  %v127_v20 = vadd.f32 %v126_v18, %v73_v12 }
  0x9d   :  { %131 = vst [vmem:[#allocation8 + $0x10] sm:$0xff] %v104_v19 }
  0x9e   :  { %132 = vst [vmem:[#allocation8 + $0x18] sm:$0xff] %v127_v20 }
  0x9f   :  { %145 = dma.vmem_to_hbm [thread:$0]  %s138_s29, 512, %s140_s5, [#allocation4], %s276_s20, %s276_s20, %s277_s21  }
  0xa0   :  { %273 = dma.done.wait [#allocation4], 512  }
  0xa1   :  { %274 = vsyncadd [#allocation4], 4294966784 }
  0xa2   :  { %150 = vsyncpa [#allocation3], 1 }
  0xa3   :  { %151 = vsyncpa [#allocation6], 1 }
  0xa4   :  { %152 = vsyncpa [#allocation4], 1 }

</bundles_post_ra>
